<compile_context>
chip_gen: v7x
topology: tpu7x:2x2x1
jax: 0.10.0
libtpu: 0.0.40
codegen_flags: <defaults>
</compile_context>

<pallas_src>
import jax
import jax.numpy as jnp
from jax.experimental import pallas as pl
from jax.experimental.pallas import tpu as pltpu

EMB_DIM = 300
HID_DIM = 200
EMB_PAD = 384            # 300 padded up to a multiple of 128
HID_PAD = 256            # 200 padded up to a multiple of 128
LEAKY_SLOPE = 0.2


def _discriminator_kernel(x_ref, w1_ref, b1_ref, w2_ref, b2_ref,
                          w3_ref, b3_ref, o_ref):
    # TODO(synk): nn.Dropout layers are identity in inference mode; no RNG here.
    x = x_ref[...]                                                   # (tm, 384) bf16

    # Linear(300->200) + LeakyReLU(0.2)   (padded 384->256, f32 accumulation)
    h = jnp.dot(x, w1_ref[...], preferred_element_type=jnp.float32) + b1_ref[...]
    h = jnp.where(h > 0, h, LEAKY_SLOPE * h)                         # (tm, 256) f32

    # Linear(200->200) + LeakyReLU(0.2)
    h2 = jnp.dot(h.astype(jnp.bfloat16), w2_ref[...],
                 preferred_element_type=jnp.float32) + b2_ref[...]
    h2 = jnp.where(h2 > 0, h2, LEAKY_SLOPE * h2)                     # (tm, 256) f32

    # Linear(200->1) + Sigmoid, computed as w3_row @ h2^T so the result is a
    # lane-dense (1, tm) row (full unmasked stores to the output slab).
    z = jax.lax.dot_general(w3_ref[...], h2,
                            (((1,), (1,)), ((), ())),
                            preferred_element_type=jnp.float32)      # (1, tm)
    z = z + b3_ref[...]                                              # (1,1) broadcast
    o_ref[...] = jax.nn.sigmoid(z)                                   # (1, tm) f32


def discriminator_forward(x, params, *, tm=512):
    """x: [N, 300] float32 -> [N] float32 (sigmoid score per row)."""
    N, D = x.shape
    assert D == EMB_DIM
    w1, b1, w2, b2, w3, b3 = params

    # Row tile: multiple of 128, capped so tiny batches do not over-pad.
    tm = int(max(128, min(tm, pl.cdiv(N, 128) * 128)))
    num_tiles = pl.cdiv(N, tm)
    n_pad = num_tiles * tm

    # Pad once in HBM to lane-aligned shapes; stream x / W1 / W2 as bf16.
    xp = jnp.zeros((n_pad, EMB_PAD), jnp.bfloat16).at[:N, :EMB_DIM].set(
        x.astype(jnp.bfloat16))
    w1p = jnp.zeros((EMB_PAD, HID_PAD), jnp.bfloat16).at[:EMB_DIM, :HID_DIM].set(
        w1.astype(jnp.bfloat16))
    b1p = jnp.zeros((1, HID_PAD), jnp.float32).at[:, :HID_DIM].set(b1)
    w2p = jnp.zeros((HID_PAD, HID_PAD), jnp.bfloat16).at[:HID_DIM, :HID_DIM].set(
        w2.astype(jnp.bfloat16))
    b2p = jnp.zeros((1, HID_PAD), jnp.float32).at[:, :HID_DIM].set(b2)
    w3p = jnp.zeros((1, HID_PAD), jnp.float32).at[:, :HID_DIM].set(
        w3.reshape(1, HID_DIM))                    # stored as a row vector
    b3p = b3.reshape(1, 1).astype(jnp.float32)

    out = pl.pallas_call(
        _discriminator_kernel,
        out_shape=jax.ShapeDtypeStruct((1, n_pad), jnp.float32),
        grid_spec=pltpu.PrefetchScalarGridSpec(
            num_scalar_prefetch=0,
            grid=(num_tiles,),
            in_specs=[
                pl.BlockSpec((tm, EMB_PAD), lambda i: (i, 0)),        # x tile
                pl.BlockSpec((EMB_PAD, HID_PAD), lambda i: (0, 0)),   # w1 (resident)
                pl.BlockSpec((1, HID_PAD), lambda i: (0, 0)),         # b1
                pl.BlockSpec((HID_PAD, HID_PAD), lambda i: (0, 0)),   # w2 (resident)
                pl.BlockSpec((1, HID_PAD), lambda i: (0, 0)),         # b2
                pl.BlockSpec((1, HID_PAD), lambda i: (0, 0)),         # w3 row
                pl.BlockSpec((1, 1), lambda i: (0, 0)),               # b3
            ],
            # Lane-dense output slab: each grid step writes lanes [i*tm, (i+1)*tm).
            out_specs=pl.BlockSpec((1, tm), lambda i: (0, i)),
        ),
        compiler_params=pltpu.CompilerParams(
            dimension_semantics=("parallel",)),
    )(xp, w1p, b1p, w2p, b2p, w3p, b3p)
    return out.reshape(-1)[:N]


def init_params(key):
    """Deterministic init mimicking nn.Linear shapes (weights stored [in, out])."""
    ks = jax.random.split(key, 6)

    def lin(kw, kb, fan_in, fan_out):
        bound = 1.0 / jnp.sqrt(fan_in)
        w = jax.random.uniform(kw, (fan_in, fan_out), jnp.float32, -bound, bound)
        b = jax.random.uniform(kb, (1, fan_out), jnp.float32, -bound, bound)
        return w, b

    w1, b1 = lin(ks[0], ks[1], EMB_DIM, HID_DIM)
    w2, b2 = lin(ks[2], ks[3], HID_DIM, HID_DIM)
    w3, b3 = lin(ks[4], ks[5], HID_DIM, 1)
    return (w1, b1, w2, b2, w3, b3)


def reference_forward_f32(x, params):
    """Pure f32 reference (module semantics)."""
    w1, b1, w2, b2, w3, b3 = params
    h = x @ w1 + b1
    h = jnp.where(h > 0, h, LEAKY_SLOPE * h)
    h = h @ w2 + b2
    h = jnp.where(h > 0, h, LEAKY_SLOPE * h)
    z = jnp.sum(h * w3.reshape(1, -1), axis=-1, keepdims=True) + b3
    return jax.nn.sigmoid(z).reshape(-1)


def reference_forward_bf16(x, params):
    """Reference that mimics the kernel's bf16-input / f32-accumulate precision."""
    w1, b1, w2, b2, w3, b3 = params
    f32 = lambda a: a.astype(jnp.bfloat16).astype(jnp.float32)
    h = f32(x) @ f32(w1) + b1
    h = jnp.where(h > 0, h, LEAKY_SLOPE * h)
    h = f32(h) @ f32(w2) + b2
    h = jnp.where(h > 0, h, LEAKY_SLOPE * h)
    z = jnp.sum(h * w3.reshape(1, -1), axis=-1, keepdims=True) + b3
    return jax.nn.sigmoid(z).reshape(-1)


if __name__ == "__main__":
    key = jax.random.PRNGKey(0)
    kx, kp = jax.random.split(key)

    N = 16                                            # small batch for the check
    x = jax.random.normal(kx, (N, EMB_DIM), jnp.float32)
    params = init_params(kp)

    out = jax.jit(discriminator_forward)(x, params)
    out = jax.block_until_ready(out)

    ref_matched = reference_forward_bf16(x, params)   # same precision recipe
    ref_f32 = reference_forward_f32(x, params)        # module semantics, f32

    assert out.shape == (N,)
    assert jnp.allclose(out, ref_matched, atol=2e-3, rtol=2e-3), \
        float(jnp.max(jnp.abs(out - ref_matched)))
    assert jnp.allclose(out, ref_f32, atol=2e-2, rtol=2e-2), \
        float(jnp.max(jnp.abs(out - ref_f32)))
    print("KERNEL_OK")
</pallas_src>

<mosaic_0001>
module attributes {stable_mosaic.version = 11 : i64} {
  func.func @_discriminator_kernel(%arg0: i32, %arg1: memref<128x384xbf16, #tpu.memory_space<vmem>>, %arg2: memref<384x256xbf16, #tpu.memory_space<vmem>>, %arg3: memref<1x256xf32, #tpu.memory_space<vmem>>, %arg4: memref<256x256xbf16, #tpu.memory_space<vmem>>, %arg5: memref<1x256xf32, #tpu.memory_space<vmem>>, %arg6: memref<1x256xf32, #tpu.memory_space<vmem>>, %arg7: memref<1x1xf32, #tpu.memory_space<vmem>>, %arg8: memref<1x128xf32, #tpu.memory_space<vmem>>) attributes {dimension_semantics = [#tpu.dimension_semantics<parallel>], iteration_bounds = array<i64: 1>, scalar_prefetch = 0 : i64, scratch_operands = 0 : i64, tpu.core_type = #tpu.core_type<tc>, window_params = [{transform_indices = @transform_0, window_bounds = array<i64: 128, 384>}, {pipeline_mode = #tpu.pipeline_mode<synchronous>, transform_indices = @transform_1, window_bounds = array<i64: 384, 256>}, {pipeline_mode = #tpu.pipeline_mode<synchronous>, transform_indices = @transform_2, window_bounds = array<i64: 1, 256>}, {pipeline_mode = #tpu.pipeline_mode<synchronous>, transform_indices = @transform_3, window_bounds = array<i64: 256, 256>}, {pipeline_mode = #tpu.pipeline_mode<synchronous>, transform_indices = @transform_4, window_bounds = array<i64: 1, 256>}, {pipeline_mode = #tpu.pipeline_mode<synchronous>, transform_indices = @transform_5, window_bounds = array<i64: 1, 256>}, {pipeline_mode = #tpu.pipeline_mode<synchronous>, transform_indices = @transform_6, window_bounds = array<i64: 1, 1>}, {transform_indices = @transform_7, window_bounds = array<i64: 1, 128>}]} {
    %c0 = arith.constant 0 : index
    %c0_0 = arith.constant 0 : index
    %0 = vector.load %arg1[%c0, %c0_0] : memref<128x384xbf16, #tpu.memory_space<vmem>>, vector<128x384xbf16>
    %c0_1 = arith.constant 0 : index
    %c0_2 = arith.constant 0 : index
    %1 = vector.load %arg2[%c0_1, %c0_2] : memref<384x256xbf16, #tpu.memory_space<vmem>>, vector<384x256xbf16>
    %cst = arith.constant dense<0.000000e+00> : vector<128x256xf32>
    %2 = tpu.matmul %0, %1, %cst {dimension_numbers = #tpu.dot_dimension_numbers<[1], [0], [0], [1], [0, 0, 1, 1], [], []>} : vector<128x384xbf16>, vector<384x256xbf16>, vector<128x256xf32> -> vector<128x256xf32>
    %c0_3 = arith.constant 0 : index
    %c0_4 = arith.constant 0 : index
    %3 = vector.load %arg3[%c0_3, %c0_4] : memref<1x256xf32, #tpu.memory_space<vmem>>, vector<1x256xf32>
    %4 = vector.broadcast %3 : vector<1x256xf32> to vector<128x256xf32>
    %5 = arith.addf %2, %4 : vector<128x256xf32>
    %cst_5 = arith.constant 0.000000e+00 : f32
    %6 = vector.broadcast %cst_5 : f32 to vector<128x256xf32>
    %7 = arith.cmpf ogt, %5, %6 : vector<128x256xf32>
    %cst_6 = arith.constant 2.000000e-01 : f32
    %8 = vector.broadcast %cst_6 : f32 to vector<128x256xf32>
    %9 = arith.mulf %8, %5 : vector<128x256xf32>
    %10 = arith.select %7, %5, %9 : vector<128x256xi1>, vector<128x256xf32>
    %11 = arith.truncf %10 : vector<128x256xf32> to vector<128x256xbf16>
    %c0_7 = arith.constant 0 : index
    %c0_8 = arith.constant 0 : index
    %12 = vector.load %arg4[%c0_7, %c0_8] : memref<256x256xbf16, #tpu.memory_space<vmem>>, vector<256x256xbf16>
    %cst_9 = arith.constant dense<0.000000e+00> : vector<128x256xf32>
    %13 = tpu.matmul %11, %12, %cst_9 {dimension_numbers = #tpu.dot_dimension_numbers<[1], [0], [0], [1], [0, 0, 1, 1], [], []>} : vector<128x256xbf16>, vector<256x256xbf16>, vector<128x256xf32> -> vector<128x256xf32>
    %c0_10 = arith.constant 0 : index
    %c0_11 = arith.constant 0 : index
    %14 = vector.load %arg5[%c0_10, %c0_11] : memref<1x256xf32, #tpu.memory_space<vmem>>, vector<1x256xf32>
    %15 = vector.broadcast %14 : vector<1x256xf32> to vector<128x256xf32>
    %16 = arith.addf %13, %15 : vector<128x256xf32>
    %cst_12 = arith.constant 0.000000e+00 : f32
    %17 = vector.broadcast %cst_12 : f32 to vector<128x256xf32>
    %18 = arith.cmpf ogt, %16, %17 : vector<128x256xf32>
    %cst_13 = arith.constant 2.000000e-01 : f32
    %19 = vector.broadcast %cst_13 : f32 to vector<128x256xf32>
    %20 = arith.mulf %19, %16 : vector<128x256xf32>
    %21 = arith.select %18, %16, %20 : vector<128x256xi1>, vector<128x256xf32>
    %c0_14 = arith.constant 0 : index
    %c0_15 = arith.constant 0 : index
    %22 = vector.load %arg6[%c0_14, %c0_15] : memref<1x256xf32, #tpu.memory_space<vmem>>, vector<1x256xf32>
    %cst_16 = arith.constant dense<0.000000e+00> : vector<1x128xf32>
    %23 = tpu.matmul %22, %21, %cst_16 {dimension_numbers = #tpu.dot_dimension_numbers<[1], [1], [0], [0], [0, 0, 1, 0], [], []>} : vector<1x256xf32>, vector<128x256xf32>, vector<1x128xf32> -> vector<1x128xf32>
    %c0_17 = arith.constant 0 : index
    %c0_18 = arith.constant 0 : index
    %24 = vector.load %arg7[%c0_17, %c0_18] : memref<1x1xf32, #tpu.memory_space<vmem>>, vector<1x1xf32>
    %25 = vector.broadcast %24 : vector<1x1xf32> to vector<1x128xf32>
    %26 = arith.addf %23, %25 : vector<1x128xf32>
    %27 = arith.negf %26 : vector<1x128xf32>
    %28 = math.exp %27 : vector<1x128xf32>
    %cst_19 = arith.constant 1.000000e+00 : f32
    %29 = vector.broadcast %cst_19 : f32 to vector<1x128xf32>
    %30 = arith.addf %29, %28 : vector<1x128xf32>
    %31 = arith.divf %29, %30 : vector<1x128xf32>
    %c0_20 = arith.constant 0 : index
    %c0_21 = arith.constant 0 : index
    %32 = vector.load %arg8[%c0_20, %c0_21] : memref<1x128xf32, #tpu.memory_space<vmem>>, vector<1x128xf32>
    tpu.vector_store %arg8[%c0_20, %c0_21], %31 {strides = array<i32>} : memref<1x128xf32, #tpu.memory_space<vmem>>, vector<1x128xf32>,
    return
  }
  func.func @transform_0(%arg0: i32) -> (i32, i32) {
    %c0_i32 = arith.constant 0 : i32
    %c0_i32_0 = arith.constant 0 : i32
    return %arg0, %c0_i32 : i32, i32
  }
  func.func @transform_1(%arg0: i32) -> (i32, i32) {
    %c0_i32 = arith.constant 0 : i32
    %c0_i32_0 = arith.constant 0 : i32
    %c0_i32_1 = arith.constant 0 : i32
    return %c0_i32, %c0_i32_0 : i32, i32
  }
  func.func @transform_2(%arg0: i32) -> (i32, i32) {
    %c0_i32 = arith.constant 0 : i32
    %c0_i32_0 = arith.constant 0 : i32
    %c0_i32_1 = arith.constant 0 : i32
    return %c0_i32, %c0_i32_0 : i32, i32
  }
  func.func @transform_3(%arg0: i32) -> (i32, i32) {
    %c0_i32 = arith.constant 0 : i32
    %c0_i32_0 = arith.constant 0 : i32
    %c0_i32_1 = arith.constant 0 : i32
    return %c0_i32, %c0_i32_0 : i32, i32
  }
  func.func @transform_4(%arg0: i32) -> (i32, i32) {
    %c0_i32 = arith.constant 0 : i32
    %c0_i32_0 = arith.constant 0 : i32
    %c0_i32_1 = arith.constant 0 : i32
    return %c0_i32, %c0_i32_0 : i32, i32
  }
  func.func @transform_5(%arg0: i32) -> (i32, i32) {
    %c0_i32 = arith.constant 0 : i32
    %c0_i32_0 = arith.constant 0 : i32
    %c0_i32_1 = arith.constant 0 : i32
    return %c0_i32, %c0_i32_0 : i32, i32
  }
  func.func @transform_6(%arg0: i32) -> (i32, i32) {
    %c0_i32 = arith.constant 0 : i32
    %c0_i32_0 = arith.constant 0 : i32
    %c0_i32_1 = arith.constant 0 : i32
    return %c0_i32, %c0_i32_0 : i32, i32
  }
  func.func @transform_7(%arg0: i32) -> (i32, i32) {
    %c0_i32 = arith.constant 0 : i32
    %c0_i32_0 = arith.constant 0 : i32
    return %c0_i32, %arg0 : i32, i32
  }
}

</mosaic_0001>

<bundles_post_ra>
// kernel: discriminator_forward.1
= control target key start
LH: loop header
LB: loop body
LE: loop exit
PB: predicated region body
PF: predicated region fallthrough
CT: control target
= control target key end

     0   :  { %v1702_v1 = vmov 0   ;;  %s2238_s1 = inlined_call_operand.vmem [shape: bf16[384,256], index: 1, kind: input, shape index: {}]   ;;  %s2239_s0 = inlined_call_operand.vmem [shape: bf16[128,384], index: 0, kind: input, shape index: {}]   ;;  %s2240_s3 = inlined_call_operand.vmem [shape: bf16[256,256], index: 3, kind: input, shape index: {}]   ;;  %s2241_s2 = inlined_call_operand.vmem [shape: f32[1,256], index: 2, kind: input, shape index: {}]   ;;  %s2242_s5 = inlined_call_operand.vmem [shape: f32[1,256], index: 5, kind: input, shape index: {}]   ;;  %s2243_s6 = inlined_call_operand.<no memory space> [shape: f32[1,1], index: 6, kind: input, shape index: {}]   ;;  %s2244_s4 = inlined_call_operand.vmem [shape: f32[1,256], index: 4, kind: input, shape index: {}]   ;;  %s2245_s7 = inlined_call_operand.vmem [shape: f32[1,128], index: 7, kind: output, shape index: {}]  }
   0x1   :  { %v1546_v0 = vld [vmem:[%s2238_s1 + $0x4] ss:$8 sps:$4 sm:$0xff]   ;;  %634 = vmatprep.mubr.bf16.mxu1 %v1702_v1  ;;  %1545 = vset.pattern.permute.xlu0 %v1702_v1  ;;  %v1548_v2 = vld [vmem:[%s2238_s1] ss:$8 sps:$4 sm:$0xff]   ;;  %v1549_v3 = vld [vmem:[%s2238_s1 + $0x14] ss:$8 sps:$4 sm:$0xff]  }
   0x2   :  { %489 = vmatprep.subr.bf16.mxu0 %v1546_v0  ;;  %v1551_v4 = vld [vmem:[%s2238_s1 + $0x10] ss:$8 sps:$4 sm:$0xff]   ;;  %v1552_v5 = vld [vmem:[%s2238_s1 + $0x24] ss:$8 sps:$4 sm:$0xff]   ;;  %v1554_v6 = vld [vmem:[%s2238_s1 + $0x20] ss:$8 sps:$4 sm:$0xff]  }
   0x3   :  { %490 = vmatpush1.bf16.msra.mxu0 %v1548_v2  ;;  %v1555_v7 = vld [vmem:[%s2238_s1 + $0x34] ss:$8 sps:$4 sm:$0xff]   ;;  %v1557_v8 = vld [vmem:[%s2238_s1 + $0x30] ss:$8 sps:$4 sm:$0xff]   ;;  %v1570_v9 = vld [vmem:[%s2238_s1 + $0x104] ss:$8 sps:$4 sm:$0xff]  }
   0x4   :  { %491 = vmatprep.subr.bf16.mxu0 %v1549_v3  ;;  %v1558_v10 = vld [vmem:[%s2238_s1 + $0x44] ss:$8 sps:$4 sm:$0xff]   ;;  %v1574_v11 = vld [vmem:[%s2238_s1 + $0x100] ss:$8 sps:$4 sm:$0xff]   ;;  %602 = vmatprep.subr.bf16.mxu1 %v1570_v9  ;;  %v1576_v12 = vld [vmem:[%s2238_s1 + $0x114] ss:$8 sps:$4 sm:$0xff]  }
   0x5   :  { %603 = vmatpush1.bf16.msra.mxu1 %v1574_v11  ;;  %v1560_v13 = vld [vmem:[%s2238_s1 + $0x40] ss:$8 sps:$4 sm:$0xff]   ;;  %v1561_v14 = vld [vmem:[%s2238_s1 + $0x54] ss:$8 sps:$4 sm:$0xff]   ;;  %v1580_v15 = vld [vmem:[%s2238_s1 + $0x110] ss:$8 sps:$4 sm:$0xff]  }
   0x6   :  { %604 = vmatprep.subr.bf16.mxu1 %v1576_v12  ;;  %v1582_v16 = vld [vmem:[%s2238_s1 + $0x124] ss:$8 sps:$4 sm:$0xff]   ;;  %v1563_v17 = vld [vmem:[%s2238_s1 + $0x50] ss:$8 sps:$4 sm:$0xff]   ;;  %v1586_v18 = vld [vmem:[%s2238_s1 + $0x120] ss:$8 sps:$4 sm:$0xff]  }
   0x7   :  { %492 = vmatpush1.bf16.msra.mxu0 %v1551_v4  ;;  %v1588_v19 = vld [vmem:[%s2238_s1 + $0x134] ss:$8 sps:$4 sm:$0xff]   ;;  %v1564_v20 = vld [vmem:[%s2238_s1 + $0x64] ss:$8 sps:$4 sm:$0xff]   ;;  %v1592_v21 = vld [vmem:[%s2238_s1 + $0x130] ss:$8 sps:$4 sm:$0xff]  }
   0x8   :  { %493 = vmatprep.subr.bf16.mxu0 %v1552_v5  ;;  %v1566_v22 = vld [vmem:[%s2238_s1 + $0x60] ss:$8 sps:$4 sm:$0xff]   ;;  %v1594_v23 = vld [vmem:[%s2238_s1 + $0x144] ss:$8 sps:$4 sm:$0xff]   ;;  %v1567_v24 = vld [vmem:[%s2238_s1 + $0x74] ss:$8 sps:$4 sm:$0xff]  }
   0x9   :  { %605 = vmatpush1.bf16.msra.mxu1 %v1580_v15  ;;  %v1569_v25 = vld [vmem:[%s2238_s1 + $0x70] ss:$8 sps:$4 sm:$0xff]   ;;  %v1598_v26 = vld [vmem:[%s2238_s1 + $0x140] ss:$8 sps:$4 sm:$0xff]   ;;  %v1600_v27 = vld [vmem:[%s2238_s1 + $0x154] ss:$8 sps:$4 sm:$0xff]  }
   0xa   :  { %606 = vmatprep.subr.bf16.mxu1 %v1582_v16  ;;  %v1572_v28 = vld [vmem:[%s2238_s1 + $0x84] ss:$8 sps:$4 sm:$0xff]   ;;  %v1604_v29 = vld [vmem:[%s2238_s1 + $0x150] ss:$8 sps:$4 sm:$0xff]   ;;  %v1575_v30 = vld [vmem:[%s2238_s1 + $0x80] ss:$8 sps:$4 sm:$0xff]  }
   0xb   :  { %494 = vmatpush1.bf16.msra.mxu0 %v1554_v6  ;;  %v1606_v31 = vld [vmem:[%s2238_s1 + $0x164] ss:$8 sps:$4 sm:$0xff]   ;;  %v1578_v32 = vld [vmem:[%s2238_s1 + $0x94] ss:$8 sps:$4 sm:$0xff]   ;;  %v1581_v33 = vld [vmem:[%s2238_s1 + $0x90] ss:$8 sps:$4 sm:$0xff]  }
   0xc   :  { %495 = vmatprep.subr.bf16.mxu0 %v1555_v7  ;;  %v1620_v34 = vld [vmem:[%s2239_s0 + $0x4] ss:$12 sps:$4 sm:$0xff]   ;;  %v1610_v35 = vld [vmem:[%s2238_s1 + $0x160] ss:$8 sps:$4 sm:$0xff]   ;;  %v1612_v36 = vld [vmem:[%s2238_s1 + $0x174] ss:$8 sps:$4 sm:$0xff]  }
   0xd   :  { %607 = vmatpush1.bf16.msra.mxu1 %v1586_v18  ;;  %v1584_v37 = vld [vmem:[%s2238_s1 + $0xa4] ss:$8 sps:$4 sm:$0xff]   ;;  %521 = vmatprep.mubr.bf16.mxu0 %v1620_v34  ;;  %v1616_v38 = vld [vmem:[%s2238_s1 + $0x170] ss:$8 sps:$4 sm:$0xff]   ;;  %v1587_v39 = vld [vmem:[%s2238_s1 + $0xa0] ss:$8 sps:$4 sm:$0xff]  }
   0xe   :  { %608 = vmatprep.subr.bf16.mxu1 %v1588_v19  ;;  %v1590_v40 = vld [vmem:[%s2238_s1 + $0xb4] ss:$8 sps:$4 sm:$0xff]   ;;  %v1593_v42 = vld [vmem:[%s2238_s1 + $0xb0] ss:$8 sps:$4 sm:$0xff]   ;;  %v1596_v43 = vld [vmem:[%s2238_s1 + $0xc4] ss:$8 sps:$4 sm:$0xff]  }
   0xf   :  { %496 = vmatpush1.bf16.msra.mxu0 %v1557_v8  ;;  %v1621_v41 = vld [vmem:[%s2239_s0 + $0x8] ss:$12 sps:$4 sm:$0xff]   ;;  %v1624_v46 = vld [vmem:[%s2239_s0 + $0x20] ss:$12 sps:$4 sm:$0xff]   ;;  %v1605_v47 = vld [vmem:[%s2238_s1 + $0xd0] ss:$8 sps:$4 sm:$0xff]  }
  0x10   :  { %497 = vmatprep.subr.bf16.mxu0 %v1558_v10  ;;  %v1599_v44 = vld [vmem:[%s2238_s1 + $0xc0] ss:$8 sps:$4 sm:$0xff]   ;;  %v1602_v45 = vld [vmem:[%s2238_s1 + $0xd4] ss:$8 sps:$4 sm:$0xff]   ;;  %v1652_v49 = vld [vmem:[%s2240_s3 + $0x4] ss:$8 sps:$4 sm:$0xff]  }
  0x11   :  { %609 = vmatpush1.bf16.msra.mxu1 %v1592_v21  ;;  %v1650_v48 = vld [vmem:[%s2240_s3] ss:$8 sps:$4 sm:$0xff]   ;;  %v1608_v50 = vld [vmem:[%s2238_s1 + $0xe4] ss:$8 sps:$4 sm:$0xff]   ;;  %v1655_v51 = vld [vmem:[%s2240_s3 + $0x14] ss:$8 sps:$4 sm:$0xff]  }
  0x12   :  { %610 = vmatprep.subr.bf16.mxu1 %v1594_v23  ;;  %v1653_v52 = vld [vmem:[%s2240_s3 + $0x10] ss:$8 sps:$4 sm:$0xff]   ;;  %v1611_v53 = vld [vmem:[%s2238_s1 + $0xe0] ss:$8 sps:$4 sm:$0xff]   ;;  %v1658_v54 = vld [vmem:[%s2240_s3 + $0x24] ss:$8 sps:$4 sm:$0xff]  }
  0x13   :  { %498 = vmatpush1.bf16.msra.mxu0 %v1560_v13  ;;  %v1614_v55 = vld [vmem:[%s2238_s1 + $0xf4] ss:$8 sps:$4 sm:$0xff]   ;;  %v1628_v56 = vld [vmem:[%s2239_s0 + $0x38] ss:$12 sps:$4 sm:$0xff]   ;;  %v1656_v57 = vld [vmem:[%s2240_s3 + $0x20] ss:$8 sps:$4 sm:$0xff]  }
  0x14   :  { %499 = vmatprep.subr.bf16.mxu0 %v1561_v14  ;;  %v1617_v58 = vld [vmem:[%s2238_s1 + $0xf0] ss:$8 sps:$4 sm:$0xff]   ;;  %v1661_v59 = vld [vmem:[%s2240_s3 + $0x34] ss:$8 sps:$4 sm:$0xff]   ;;  %v1618_v60 = vld [vmem:[%s2239_s0] ss:$12 sps:$4 sm:$0xff]  }
  0x15   :  { %611 = vmatpush1.bf16.msra.mxu1 %v1598_v26  ;;  %v1659_v61 = vld [vmem:[%s2240_s3 + $0x30] ss:$8 sps:$4 sm:$0xff]   ;;  %v1622_v62 = vld [vmem:[%s2239_s0 + $0x1c] ss:$12 sps:$4 sm:$0xff]   ;;  %v1664_v63 = vld [vmem:[%s2240_s3 + $0x44] ss:$8 sps:$4 sm:$0xff]  }
  0x16   :  { %612 = vmatprep.subr.bf16.mxu1 %v1600_v27  ;;  %v1632_v0 = vld [vmem:[%s2239_s0 + $0x50] ss:$12 sps:$4 sm:$0xff]   ;;  %v1662_v2 = vld [vmem:[%s2240_s3 + $0x40] ss:$8 sps:$4 sm:$0xff]   ;;  %v1625_v4 = vld [vmem:[%s2239_s0 + $0x18] ss:$12 sps:$4 sm:$0xff]  }
  0x17   :  { %500 = vmatpush1.bf16.msra.mxu0 %v1563_v17  ;;  %v1667_v3 = vld [vmem:[%s2240_s3 + $0x54] ss:$8 sps:$4 sm:$0xff]   ;;  %v1665_v5 = vld [vmem:[%s2240_s3 + $0x50] ss:$8 sps:$4 sm:$0xff]   ;;  %v1670_v7 = vld [vmem:[%s2240_s3 + $0x64] ss:$8 sps:$4 sm:$0xff]  }
  0x18   :  { %501 = vmatprep.subr.bf16.mxu0 %v1564_v20  ;;  %v1626_v6 = vld [vmem:[%s2239_s0 + $0x34] ss:$12 sps:$4 sm:$0xff]   ;;  %v1629_v11 = vld [vmem:[%s2239_s0 + $0x30] ss:$12 sps:$4 sm:$0xff]   ;;  %v1630_v13 = vld [vmem:[%s2239_s0 + $0x4c] ss:$12 sps:$4 sm:$0xff]  }
  0x19   :  { %613 = vmatpush1.bf16.msra.mxu1 %v1604_v29  ;;  %v1636_v8 = vld [vmem:[%s2239_s0 + $0x68] ss:$12 sps:$4 sm:$0xff]   ;;  %v1671_v12 = vld [vmem:[%s2240_s3 + $0x70] ss:$8 sps:$4 sm:$0xff]   ;;  %v1676_v14 = vld [vmem:[%s2240_s3 + $0x84] ss:$8 sps:$4 sm:$0xff]  }
  0x1a   :  { %614 = vmatprep.subr.bf16.mxu1 %v1606_v31  ;;  %v1668_v9 = vld [vmem:[%s2240_s3 + $0x60] ss:$8 sps:$4 sm:$0xff]   ;;  %v1673_v10 = vld [vmem:[%s2240_s3 + $0x74] ss:$8 sps:$4 sm:$0xff]   ;;  %v1677_v19 = vld [vmem:[%s2240_s3 + $0x90] ss:$8 sps:$4 sm:$0xff]  }
  0x1b   :  { %502 = vmatpush1.bf16.msra.mxu0 %v1566_v22  ;;  %v1640_v15 = vld [vmem:[%s2239_s0 + $0x80] ss:$12 sps:$4 sm:$0xff]   ;;  %v1679_v17 = vld [vmem:[%s2240_s3 + $0x94] ss:$8 sps:$4 sm:$0xff]   ;;  %v1634_v20 = vld [vmem:[%s2239_s0 + $0x64] ss:$12 sps:$4 sm:$0xff]  }
  0x1c   :  { %503 = vmatprep.subr.bf16.mxu0 %v1567_v24  ;;  %v1674_v16 = vld [vmem:[%s2240_s3 + $0x80] ss:$8 sps:$4 sm:$0xff]   ;;  %v1682_v21 = vld [vmem:[%s2240_s3 + $0xa4] ss:$8 sps:$4 sm:$0xff]   ;;  %v1685_v24 = vld [vmem:[%s2240_s3 + $0xb4] ss:$8 sps:$4 sm:$0xff]  }
  0x1d   :  { %615 = vmatpush1.bf16.msra.mxu1 %v1610_v35  ;;  %v1633_v18 = vld [vmem:[%s2239_s0 + $0x48] ss:$12 sps:$4 sm:$0xff]   ;;  %v1644_v22 = vld [vmem:[%s2239_s0 + $0x98] ss:$12 sps:$4 sm:$0xff]   ;;  %v1648_v29 = vld [vmem:[%s2239_s0 + $0xb0] ss:$12 sps:$4 sm:$0xff]  }
  0x1e   :  { %616 = vmatprep.subr.bf16.mxu1 %v1612_v36  ;;  %v1680_v23 = vld [vmem:[%s2240_s3 + $0xa0] ss:$8 sps:$4 sm:$0xff]   ;;  %v1683_v26 = vld [vmem:[%s2240_s3 + $0xb0] ss:$8 sps:$4 sm:$0xff]   ;;  %v1691_v35 = vld [vmem:[%s2240_s3 + $0xd4] ss:$8 sps:$4 sm:$0xff]  }
  0x1f   :  { %504 = vmatpush1.bf16.msra.mxu0 %v1569_v25  ;;  %v1637_v25 = vld [vmem:[%s2239_s0 + $0x60] ss:$12 sps:$4 sm:$0xff]   ;;  %v1638_v27 = vld [vmem:[%s2239_s0 + $0x7c] ss:$12 sps:$4 sm:$0xff]   ;;  %v1689_v36 = vld [vmem:[%s2240_s3 + $0xd0] ss:$8 sps:$4 sm:$0xff]  }
  0x20   :  { %505 = vmatprep.subr.bf16.mxu0 %v1572_v28  ;;  %v1688_v28 = vld [vmem:[%s2240_s3 + $0xc4] ss:$8 sps:$4 sm:$0xff]   ;;  %v1642_v31 = vld [vmem:[%s2239_s0 + $0x94] ss:$12 sps:$4 sm:$0xff]  }
  0x21   :  { %617 = vmatpush1.bf16.msra.mxu1 %v1616_v38  ;;  %v1649_v34 = vld [vmem:[%s2239_s0 + $0xa8] ss:$12 sps:$4 sm:$0xff]  }
  0x22   :  { %1031 = vmatprep.subr.bf16.mxu1 %v1652_v49  ;;  %v1692_v38 = vld [vmem:[%s2240_s3 + $0xe0] ss:$8 sps:$4 sm:$0xff]  }
  0x23   :  { %506 = vmatpush1.bf16.msra.mxu0 %v1575_v30  ;;  %v1641_v30 = vld [vmem:[%s2239_s0 + $0x78] ss:$12 sps:$4 sm:$0xff]  }
  0x24   :  { %507 = vmatprep.subr.bf16.mxu0 %v1578_v32  ;;  %635 = vmatmul.mubr.bf16.vlgmr.msra.gmra.mrb[0].mxu1 %v1621_v41  ;;  %v1645_v32 = vld [vmem:[%s2239_s0 + $0x90] ss:$12 sps:$4 sm:$0xff]  }
  0x25   :  { %644 = vmatprep.mubr.bf16.mxu1 %v1702_v1  ;;  %1032 = vmatpush1.bf16.msra.mxu1 %v1650_v48 }
  0x26   :  { %1033 = vmatprep.subr.bf16.mxu1 %v1655_v51 }
  0x27   :  { %508 = vmatpush1.bf16.msra.mxu0 %v1581_v33  ;;  %v1646_v33 = vld [vmem:[%s2239_s0 + $0xac] ss:$12 sps:$4 sm:$0xff]  }
  0x28   :  { %509 = vmatprep.subr.bf16.mxu0 %v1584_v37  ;;  %v1694_v37 = vld [vmem:[%s2240_s3 + $0xe4] ss:$8 sps:$4 sm:$0xff]  }
  0x29   :  { %1034 = vmatpush1.bf16.msra.mxu1 %v1653_v52  ;;  %v109_v52 = vld [vmem:[%s2241_s2] sm:$0x3] }
  0x2a   :  { %1035 = vmatprep.subr.bf16.mxu1 %v1658_v54 }
  0x2b   :  { %510 = vmatpush1.bf16.msra.mxu0 %v1587_v39  ;;  %v1697_v39 = vld [vmem:[%s2240_s3 + $0xf4] ss:$8 sps:$4 sm:$0xff]  }
  0x2c   :  { %511 = vmatprep.subr.bf16.mxu0 %v1590_v40  ;;  %645 = vmatmul.mubr.bf16.gmra.mrb[4].mxu1 %v1624_v46  ;;  %v1695_v40 = vld [vmem:[%s2240_s3 + $0xf0] ss:$8 sps:$4 sm:$0xff]  }
  0x2d   :  { %654 = vmatprep.mubr.bf16.mxu1 %v1702_v1  ;;  %1036 = vmatpush1.bf16.msra.mxu1 %v1656_v57 }
  0x2e   :  { %1037 = vmatprep.subr.bf16.mxu1 %v1661_v59 }
  0x2f   :  { %512 = vmatpush1.bf16.msra.mxu0 %v1593_v42 }
  0x30   :  { %513 = vmatprep.subr.bf16.mxu0 %v1596_v43 }
  0x31   :  { %1038 = vmatpush1.bf16.msra.mxu1 %v1659_v61 }
  0x32   :  { %1039 = vmatprep.subr.bf16.mxu1 %v1664_v63 }
  0x33   :  { %514 = vmatpush1.bf16.msra.mxu0 %v1599_v44 }
  0x34   :  { %515 = vmatprep.subr.bf16.mxu0 %v1602_v45  ;;  %655 = vmatmul.mubr.bf16.gmra.mrb[8].mxu1 %v1628_v56  ;;  %v111_v45 = vlaneseq }
  0x35   :  { %664 = vmatprep.mubr.bf16.mxu1 %v1702_v1  ;;  %1040 = vmatpush1.bf16.msra.mxu1 %v1662_v2 }
  0x36   :  { %1041 = vmatprep.subr.bf16.mxu1 %v1667_v3  ;;  %v112_v48 = vshrl.u32 %v111_v45, 7 }
  0x37   :  { %516 = vmatpush1.bf16.msra.mxu0 %v1605_v47 }
  0x38   :  { %517 = vmatprep.subr.bf16.mxu0 %v1608_v50  ;;  %v2064_v51 = vsub.s32 0, %v112_v48 }
  0x39   :  { %1042 = vmatpush1.bf16.msra.mxu1 %v1665_v5 }
  0x3a   :  { %1043 = vmatprep.subr.bf16.mxu1 %v1670_v7  ;;  %v2076_v56 = vrot.slane %v109_v52, %v2064_v51 }
  0x3b   :  { %518 = vmatpush1.bf16.msra.mxu0 %v1611_v53  ;;  %v2069_v53 = vsub.s32 1, %v112_v48 }
  0x3c   :  { %519 = vmatprep.subr.bf16.mxu0 %v1614_v55  ;;  %665 = vmatmul.mubr.bf16.gmra.mrb[12].mxu1 %v1632_v0 }
  0x3d   :  { %674 = vmatprep.mubr.bf16.mxu1 %v1702_v1  ;;  %1044 = vmatpush1.bf16.msra.mxu1 %v1668_v9 }
  0x3e   :  { %1045 = vmatprep.subr.bf16.mxu1 %v1673_v10 }
  0x3f   :  { %520 = vmatpush1.bf16.msra.mxu0 %v1617_v58  ;;  %v2081_v58 = vrot.slane %v109_v52, %v2069_v53 }
  0x41   :  { %1046 = vmatpush1.bf16.msra.mxu1 %v1671_v12 }
  0x42   :  { %522 = vmatmul.mubr.bf16.vlgmr.msra.gmra.mrb[0].mxu0 %v1618_v60  ;;  %1047 = vmatprep.subr.bf16.mxu1 %v1676_v14 }
  0x43   :  { %531 = vmatprep.mubr.bf16.mxu0 %v1622_v62 }
  0x44   :  { %675 = vmatmul.mubr.bf16.gmra.mrb[16].mxu1 %v1636_v8 }
  0x45   :  { %684 = vmatprep.mubr.bf16.mxu1 %v1702_v1  ;;  %1048 = vmatpush1.bf16.msra.mxu1 %v1674_v16 }
  0x46   :  { %1049 = vmatprep.subr.bf16.mxu1 %v1679_v17 }
  0x49   :  { %1050 = vmatpush1.bf16.msra.mxu1 %v1677_v19 }
  0x4a   :  { %532 = vmatmul.mubr.bf16.gmra.mrb[4].mxu0 %v1625_v4  ;;  %1051 = vmatprep.subr.bf16.mxu1 %v1682_v21 }
  0x4b   :  { %541 = vmatprep.mubr.bf16.mxu0 %v1626_v6 }
  0x4c   :  { %685 = vmatmul.mubr.bf16.gmra.mrb[20].mxu1 %v1640_v15 }
  0x4d   :  { %694 = vmatprep.mubr.bf16.mxu1 %v1702_v1  ;;  %1052 = vmatpush1.bf16.msra.mxu1 %v1680_v23 }
  0x4e   :  { %1053 = vmatprep.subr.bf16.mxu1 %v1685_v24 }
  0x51   :  { %1054 = vmatpush1.bf16.msra.mxu1 %v1683_v26 }
  0x52   :  { %542 = vmatmul.mubr.bf16.gmra.mrb[8].mxu0 %v1629_v11  ;;  %1055 = vmatprep.subr.bf16.mxu1 %v1688_v28 }
  0x53   :  { %551 = vmatprep.mubr.bf16.mxu0 %v1630_v13 }
  0x54   :  { %695 = vmatmul.mubr.bf16.gmra.mrb[24].mxu1 %v1644_v22 }
  0x55   :  { %704 = vmatprep.mubr.bf16.mxu1 %v1702_v1  ;;  %v1686_v1 = vld [vmem:[%s2240_s3 + $0xc0] ss:$8 sps:$4 sm:$0xff]  }
  0x56   :  { %1056 = vmatpush1.bf16.msra.mxu1 %v1686_v1 }
  0x57   :  { %1057 = vmatprep.subr.bf16.mxu1 %v1691_v35 }
  0x5a   :  { %552 = vmatmul.mubr.bf16.gmra.mrb[12].mxu0 %v1633_v18  ;;  %1058 = vmatpush1.bf16.msra.mxu1 %v1689_v36 }
  0x5b   :  { %561 = vmatprep.mubr.bf16.mxu0 %v1634_v20  ;;  %1059 = vmatprep.subr.bf16.mxu1 %v1694_v37 }
  0x5c   :  { %705 = vmatmul.mubr.bf16.gmra.mrb[28].mxu1 %v1648_v29 }
  0x5e   :  { %1060 = vmatpush1.bf16.msra.mxu1 %v1692_v38 }
  0x5f   :  { %1061 = vmatprep.subr.bf16.mxu1 %v1697_v39 }
  0x62   :  { %562 = vmatmul.mubr.bf16.gmra.mrb[16].mxu0 %v1637_v25  ;;  %1062 = vmatpush1.bf16.msra.mxu1 %v1695_v40 }
  0x63   :  { %571 = vmatprep.mubr.bf16.mxu0 %v1638_v27 }
  0x6a   :  { %572 = vmatmul.mubr.bf16.gmra.mrb[20].mxu0 %v1641_v30 }
  0x6b   :  { %581 = vmatprep.mubr.bf16.mxu0 %v1642_v31 }
  0x72   :  { %582 = vmatmul.mubr.bf16.gmra.mrb[24].mxu0 %v1645_v32 }
  0x73   :  { %591 = vmatprep.mubr.bf16.mxu0 %v1646_v33 }
  0x7a   :  { %592 = vmatmul.mubr.bf16.gmra.mrb[28].mxu0 %v1649_v34 }
  0xf7   :  { %v636_v41 = vpop.f32.mrb[0].mxu1 }
  0xf8   :  { %v638_v42 = vpop.f32.mrb[1].mxu1 }
  0xf9   :  { %v640_v43 = vpop.f32.mrb[2].mxu1 }
  0xfa   :  { %v642_v44 = vpop.f32.mrb[3].mxu1 }
  0xff   :  { %v646_v46 = vpop.f32.mrb[4].mxu1 }
 0x100   :  { %v648_v47 = vpop.f32.mrb[5].mxu1 }
 0x101   :  { %v650_v49 = vpop.f32.mrb[6].mxu1 }
 0x102   :  { %v652_v50 = vpop.f32.mrb[7].mxu1 }
 0x107   :  { %v2071_v54 = vpop.f32.mrb[8].mxu1 }
 0x108   :  { %v2073_v55 = vpop.f32.mrb[9].mxu1 }
 0x109   :  { %v2078_v57 = vpop.f32.mrb[10].mxu1 }
 0x10a   :  { %v2083_v59 = vpop.f32.mrb[11].mxu1 }
 0x10f   :  { %v2088_v5 = vpop.f32.mrb[12].mxu1 }
 0x110   :  { %v2091_v8 = vpop.f32.mrb[13].mxu1 }
 0x111   :  { %v2093_v11 = vpop.f32.mrb[14].mxu1 }
 0x112   :  { %v2095_v14 = vpop.f32.mrb[15].mxu1 }
 0x115   :  { %v523_v60 = vpop.f32.mrb[0].mxu0 }
 0x116   :  { %v524_v61 = vadd.f32 %v523_v60, %v2076_v56  ;;  %v525_v62 = vpop.f32.mrb[1].mxu0 }
 0x117   :  { %v526_v63 = vadd.f32 %v525_v62, %v2081_v58  ;;  %v527_v0 = vpop.f32.mrb[2].mxu0  ;;  %v2100_v30 = vpop.f32.mrb[16].mxu1 }
 0x118   :  { %v637_v2 = vadd.f32 %v636_v41, %v524_v61  ;;  %v528_v3 = vadd.f32 %v527_v0, %v2076_v56  ;;  %v529_v4 = vpop.f32.mrb[3].mxu0  ;;  %v2103_v33 = vpop.f32.mrb[17].mxu1 }
 0x119   :  { %v639_v6 = vadd.f32 %v638_v42, %v526_v63  ;;  %v530_v7 = vadd.f32 %v529_v4, %v2081_v58  ;;  %v2105_v36 = vpop.f32.mrb[18].mxu1 }
 0x11a   :  { %v747_v9 = vmul.f32 0.2, %v637_v2  ;;  %v641_v10 = vadd.f32 %v640_v43, %v528_v3  ;;  %vm715_vm0 = vcmp.gt.f32.partialorder %v637_v2, 0.0  ;;  %v2107_v39 = vpop.f32.mrb[19].mxu1 }
 0x11b   :  { %v748_v12 = vmul.f32 0.2, %v639_v6  ;;  %v643_v13 = vadd.f32 %v642_v44, %v530_v7  ;;  %vm716_vm1 = vcmp.gt.f32.partialorder %v639_v6, 0.0 }
 0x11c   :  { %vm717_vm2 = vcmp.gt.f32.partialorder %v641_v10, 0.0  ;;  %v749_v15 = vmul.f32 0.2, %v641_v10  ;;  %v779_v18 = vsel %vm715_vm0, %v637_v2, %v747_v9 }
 0x11d   :  { %vm718_vm3 = vcmp.gt.f32.partialorder %v643_v13, 0.0  ;;  %v750_v16 = vmul.f32 0.2, %v643_v13  ;;  %v533_v17 = vpop.f32.mrb[4].mxu0  ;;  %v780_v25 = vsel %vm716_vm1, %v639_v6, %v748_v12 }
 0x11e   :  { %v781_v19 = vsel %vm717_vm2, %v641_v10, %v749_v15  ;;  %v534_v20 = vadd.f32 %v533_v17, %v2076_v56  ;;  %v535_v21 = vpop.f32.mrb[5].mxu0 }
 0x11f   :  { %v811_v22 = vpack.c.bf16 %v781_v19, %v779_v18  ;;  %v536_v23 = vadd.f32 %v535_v21, %v2081_v58  ;;  %v537_v24 = vpop.f32.mrb[6].mxu0  ;;  %v782_v26 = vsel %vm718_vm3, %v643_v13, %v750_v16  ;;  %v2113_v0 = vpop.f32.mrb[20].mxu1 }
 0x120   :  { %v647_v27 = vadd.f32 %v646_v46, %v534_v20  ;;  %v538_v28 = vadd.f32 %v537_v24, %v2076_v56  ;;  %v539_v29 = vpop.f32.mrb[7].mxu0  ;;  %v812_v1 = vpack.c.bf16 %v782_v26, %v780_v25  ;;  %v2117_v4 = vpop.f32.mrb[21].mxu1 }
 0x121   :  { %v649_v31 = vadd.f32 %v648_v47, %v536_v23  ;;  %v540_v32 = vadd.f32 %v539_v29, %v2081_v58  ;;  %v2120_v9 = vpop.f32.mrb[22].mxu1 }
 0x122   :  { %v751_v34 = vmul.f32 0.2, %v647_v27  ;;  %v651_v35 = vadd.f32 %v650_v49, %v538_v28  ;;  %1063 = vmatprep.mubr.bf16.mxu1 %v812_v1  ;;  %vm719_vm4 = vcmp.gt.f32.partialorder %v647_v27, 0.0  ;;  %v2123_v12 = vpop.f32.mrb[23].mxu1 }
 0x123   :  { %v752_v37 = vmul.f32 0.2, %v649_v31  ;;  %v653_v38 = vadd.f32 %v652_v50, %v540_v32  ;;  %1064 = vmatmul.mubr.bf16.vlgmr.msra.gmra.mrb[32].mxu1 %v811_v22  ;;  %vm720_vm5 = vcmp.gt.f32.partialorder %v649_v31, 0.0 }
 0x124   :  { %vm721_vm6 = vcmp.gt.f32.partialorder %v651_v35, 0.0  ;;  %v753_v40 = vmul.f32 0.2, %v651_v35  ;;  %v783_v45 = vsel %vm719_vm4, %v647_v27, %v751_v34 }
 0x125   :  { %vm722_vm7 = vcmp.gt.f32.partialorder %v653_v38, 0.0  ;;  %v754_v41 = vmul.f32 0.2, %v653_v38  ;;  %v543_v42 = vpop.f32.mrb[8].mxu0  ;;  %v784_v49 = vsel %vm720_vm5, %v649_v31, %v752_v37 }
 0x126   :  { %v544_v43 = vadd.f32 %v543_v42, %v2076_v56  ;;  %v545_v44 = vpop.f32.mrb[9].mxu0  ;;  %v785_v46 = vsel %vm721_vm6, %v651_v35, %v753_v40 }
 0x127   :  { %v546_v47 = vadd.f32 %v545_v44, %v2081_v58  ;;  %v547_v48 = vpop.f32.mrb[10].mxu0  ;;  %v786_v52 = vsel %vm722_vm7, %v653_v38, %v754_v41  ;;  %v813_v50 = vpack.c.bf16 %v785_v46, %v783_v45  ;;  %v2129_v27 = vpop.f32.mrb[24].mxu1 }
 0x128   :  { %v657_v60 = vadd.f32 %v2071_v54, %v544_v43  ;;  %v548_v61 = vadd.f32 %v547_v48, %v2076_v56  ;;  %v549_v62 = vpop.f32.mrb[11].mxu0  ;;  %v814_v63 = vpack.c.bf16 %v786_v52, %v784_v49  ;;  %v2133_v1 = vpop.f32.mrb[25].mxu1 }
 0x129   :  { %v659_v2 = vadd.f32 %v2073_v55, %v546_v47  ;;  %v550_v3 = vadd.f32 %v549_v62, %v2081_v58  ;;  %v2136_v34 = vpop.f32.mrb[26].mxu1 }
 0x12a   :  { %v755_v6 = vmul.f32 0.2, %v657_v60  ;;  %v661_v7 = vadd.f32 %v2078_v57, %v548_v61  ;;  %1073 = vmatprep.mubr.bf16.mxu1 %v814_v63  ;;  %vm723_vm8 = vcmp.gt.f32.partialorder %v657_v60, 0.0  ;;  %v2139_v37 = vpop.f32.mrb[27].mxu1 }
 0x12b   :  { %v756_v54 = vmul.f32 0.2, %v659_v2  ;;  %v663_v10 = vadd.f32 %v2083_v59, %v550_v3  ;;  %1074 = vmatmul.mubr.bf16.gmra.mrb[36].mxu1 %v813_v50  ;;  %vm724_vm9 = vcmp.gt.f32.partialorder %v659_v2, 0.0 }
 0x12c   :  { %vm725_vm10 = vcmp.gt.f32.partialorder %v661_v7, 0.0  ;;  %v757_v55 = vmul.f32 0.2, %v661_v7  ;;  %v787_v57 = vsel %vm723_vm8, %v657_v60, %v755_v6 }
 0x12d   :  { %vm726_vm11 = vcmp.gt.f32.partialorder %v663_v10, 0.0  ;;  %v758_v13 = vmul.f32 0.2, %v663_v10  ;;  %v553_v15 = vpop.f32.mrb[12].mxu0  ;;  %v788_v21 = vsel %vm724_vm9, %v659_v2, %v756_v54 }
 0x12e   :  { %v554_v16 = vadd.f32 %v553_v15, %v2076_v56  ;;  %v555_v17 = vpop.f32.mrb[13].mxu0  ;;  %v789_v18 = vsel %vm725_vm10, %v661_v7, %v757_v55 }
 0x12f   :  { %v556_v19 = vadd.f32 %v555_v17, %v2081_v58  ;;  %v557_v20 = vpop.f32.mrb[14].mxu0  ;;  %v790_v22 = vsel %vm726_vm11, %v663_v10, %v758_v13  ;;  %v815_v59 = vpack.c.bf16 %v789_v18, %v787_v57  ;;  %v2145_v60 = vpop.f32.mrb[28].mxu1 }
 0x130   :  { %v667_v23 = vadd.f32 %v2088_v5, %v554_v16  ;;  %v558_v24 = vadd.f32 %v557_v20, %v2076_v56  ;;  %v559_v25 = vpop.f32.mrb[15].mxu0  ;;  %v816_v26 = vpack.c.bf16 %v790_v22, %v788_v21  ;;  %v2149_v63 = vpop.f32.mrb[29].mxu1 }
 0x131   :  { %v669_v28 = vadd.f32 %v2091_v8, %v556_v19  ;;  %v560_v29 = vadd.f32 %v559_v25, %v2081_v58  ;;  %v2152_v6 = vpop.f32.mrb[30].mxu1 }
 0x132   :  { %v759_v31 = vmul.f32 0.2, %v667_v23  ;;  %v671_v32 = vadd.f32 %v2093_v11, %v558_v24  ;;  %1083 = vmatprep.mubr.bf16.mxu1 %v816_v26  ;;  %vm727_vm12 = vcmp.gt.f32.partialorder %v667_v23, 0.0  ;;  %v2155_v54 = vpop.f32.mrb[31].mxu1 }
 0x133   :  { %v760_v5 = vmul.f32 0.2, %v669_v28  ;;  %v673_v35 = vadd.f32 %v2095_v14, %v560_v29  ;;  %1084 = vmatmul.mubr.bf16.gmra.mrb[40].mxu1 %v815_v59  ;;  %vm728_vm13 = vcmp.gt.f32.partialorder %v669_v28, 0.0 }
 0x134   :  { %vm729_vm14 = vcmp.gt.f32.partialorder %v671_v32, 0.0  ;;  %v761_v8 = vmul.f32 0.2, %v671_v32  ;;  %v791_v11 = vsel %vm727_vm12, %v667_v23, %v759_v31 }
 0x135   :  { %vm730_vm15 = vcmp.gt.f32.partialorder %v673_v35, 0.0  ;;  %v762_v38 = vmul.f32 0.2, %v673_v35  ;;  %v563_v40 = vpop.f32.mrb[16].mxu0  ;;  %v792_v46 = vsel %vm728_vm13, %v669_v28, %v760_v5 }
 0x136   :  { %v564_v41 = vadd.f32 %v563_v40, %v2076_v56  ;;  %v565_v42 = vpop.f32.mrb[17].mxu0  ;;  %v793_v43 = vsel %vm729_vm14, %v671_v32, %v761_v8 }
 0x137   :  { %v566_v44 = vadd.f32 %v565_v42, %v2081_v58  ;;  %v567_v45 = vpop.f32.mrb[18].mxu0  ;;  %v794_v47 = vsel %vm730_vm15, %v673_v35, %v762_v38  ;;  %v817_v14 = vpack.c.bf16 %v793_v43, %v791_v11 }
 0x138   :  { %v677_v48 = vadd.f32 %v2100_v30, %v564_v41  ;;  %v568_v49 = vadd.f32 %v567_v45, %v2076_v56  ;;  %v569_v52 = vpop.f32.mrb[19].mxu0  ;;  %v818_v50 = vpack.c.bf16 %v794_v47, %v792_v46 }
 0x139   :  { %v679_v61 = vadd.f32 %v2103_v33, %v566_v44  ;;  %v570_v62 = vadd.f32 %v569_v52, %v2081_v58 }
 0x13a   :  { %v763_v2 = vmul.f32 0.2, %v677_v48  ;;  %v681_v3 = vadd.f32 %v2105_v36, %v568_v49  ;;  %1093 = vmatprep.mubr.bf16.mxu1 %v818_v50  ;;  %vm731_vm0 = vcmp.gt.f32.partialorder %v677_v48, 0.0 }
 0x13b   :  { %v764_v30 = vmul.f32 0.2, %v679_v61  ;;  %v683_v7 = vadd.f32 %v2107_v39, %v570_v62  ;;  %1094 = vmatmul.mubr.bf16.gmra.mrb[44].mxu1 %v817_v14  ;;  %vm732_vm1 = vcmp.gt.f32.partialorder %v679_v61, 0.0 }
 0x13c   :  { %vm733_vm2 = vcmp.gt.f32.partialorder %v681_v3, 0.0  ;;  %v765_v33 = vmul.f32 0.2, %v681_v3  ;;  %v795_v36 = vsel %vm731_vm0, %v677_v48, %v763_v2 }
 0x13d   :  { %vm734_vm3 = vcmp.gt.f32.partialorder %v683_v7, 0.0  ;;  %v766_v10 = vmul.f32 0.2, %v683_v7  ;;  %v573_v55 = vpop.f32.mrb[20].mxu0  ;;  %v796_v18 = vsel %vm732_vm1, %v679_v61, %v764_v30 }
 0x13e   :  { %v574_v13 = vadd.f32 %v573_v55, %v2076_v56  ;;  %v575_v15 = vpop.f32.mrb[21].mxu0  ;;  %v797_v16 = vsel %vm733_vm2, %v681_v3, %v765_v33 }
 0x13f   :  { %v576_v17 = vadd.f32 %v575_v15, %v2081_v58  ;;  %v577_v57 = vpop.f32.mrb[22].mxu0  ;;  %v798_v19 = vsel %vm734_vm3, %v683_v7, %v766_v10  ;;  %v819_v39 = vpack.c.bf16 %v797_v16, %v795_v36 }
 0x140   :  { %v687_v20 = vadd.f32 %v2113_v0, %v574_v13  ;;  %v578_v21 = vadd.f32 %v577_v57, %v2076_v56  ;;  %v579_v22 = vpop.f32.mrb[23].mxu0  ;;  %v820_v59 = vpack.c.bf16 %v798_v19, %v796_v18 }
 0x141   :  { %v689_v23 = vadd.f32 %v2117_v4, %v576_v17  ;;  %v580_v24 = vadd.f32 %v579_v22, %v2081_v58  ;;  %v12_v22 = vstv %s2243_s6 }
 0x142   :  { %v767_v25 = vmul.f32 0.2, %v687_v20  ;;  %v691_v26 = vadd.f32 %v2120_v9, %v578_v21  ;;  %1103 = vmatprep.mubr.bf16.mxu1 %v820_v59  ;;  %vm735_vm4 = vcmp.gt.f32.partialorder %v687_v20, 0.0  ;;  %13 = vst [vmem:[#allocation2] sm:$0x1] %v12_v22 }
 0x143   :  { %v768_v28 = vmul.f32 0.2, %v689_v23  ;;  %v693_v29 = vadd.f32 %v2123_v12, %v580_v24  ;;  %1104 = vmatmul.mubr.bf16.gmra.mrb[48].mxu1 %v819_v39  ;;  %vm736_vm5 = vcmp.gt.f32.partialorder %v689_v23, 0.0 }
 0x144   :  { %vm737_vm6 = vcmp.gt.f32.partialorder %v691_v26, 0.0  ;;  %v769_v0 = vmul.f32 0.2, %v691_v26  ;;  %v799_v35 = vsel %vm735_vm4, %v687_v20, %v767_v25 }
 0x145   :  { %vm738_vm7 = vcmp.gt.f32.partialorder %v693_v29, 0.0  ;;  %v770_v31 = vmul.f32 0.2, %v693_v29  ;;  %v583_v32 = vpop.f32.mrb[24].mxu0  ;;  %v800_v40 = vsel %vm736_vm5, %v689_v23, %v768_v28  ;;  %v859_v23 = vld [vmem:[%s2244_s4] sm:$0x3] }
 0x146   :  { %v584_v5 = vadd.f32 %v583_v32, %v2076_v56  ;;  %v585_v4 = vpop.f32.mrb[25].mxu0  ;;  %v801_v8 = vsel %vm737_vm6, %v691_v26, %v769_v0  ;;  %v2195_v24 = vrot.slane %v859_v23, %v2064_v51  ;;  %v2198_v25 = vrot.slane %v859_v23, %v2069_v53 }
 0x147   :  { %v586_v38 = vadd.f32 %v585_v4, %v2081_v58  ;;  %v587_v9 = vpop.f32.mrb[26].mxu0  ;;  %v802_v41 = vsel %vm738_vm7, %v693_v29, %v770_v31  ;;  %v821_v42 = vpack.c.bf16 %v801_v8, %v799_v35 }
 0x148   :  { %v697_v12 = vadd.f32 %v2129_v27, %v584_v5  ;;  %v588_v11 = vadd.f32 %v587_v9, %v2076_v56  ;;  %v589_v43 = vpop.f32.mrb[27].mxu0  ;;  %v822_v44 = vpack.c.bf16 %v802_v41, %v800_v40 }
 0x149   :  { %v699_v45 = vadd.f32 %v2133_v1, %v586_v38  ;;  %v590_v46 = vadd.f32 %v589_v43, %v2081_v58  ;;  %v1241_v59 = vld [vmem:[#allocation2] sm:$0x1] }
 0x14a   :  { %v771_v47 = vmul.f32 0.2, %v697_v12  ;;  %v701_v14 = vadd.f32 %v2136_v34, %v588_v11  ;;  %1113 = vmatprep.mubr.bf16.mxu1 %v822_v44  ;;  %vm739_vm8 = vcmp.gt.f32.partialorder %v697_v12, 0.0  ;;  %1244 = vperm.xlu0 %1545, %v1241_v59  }
 0x14b   :  { %v772_v48 = vmul.f32 0.2, %v699_v45  ;;  %v703_v49 = vadd.f32 %v2139_v37, %v590_v46  ;;  %1114 = vmatmul.mubr.bf16.gmra.mrb[52].mxu1 %v821_v42  ;;  %vm740_vm9 = vcmp.gt.f32.partialorder %v699_v45, 0.0 }
 0x14c   :  { %vm741_vm10 = vcmp.gt.f32.partialorder %v701_v14, 0.0  ;;  %v773_v27 = vmul.f32 0.2, %v701_v14  ;;  %v803_v62 = vsel %vm739_vm8, %v697_v12, %v771_v47 }
 0x14d   :  { %vm742_vm11 = vcmp.gt.f32.partialorder %v703_v49, 0.0  ;;  %v774_v52 = vmul.f32 0.2, %v703_v49  ;;  %v593_v50 = vpop.f32.mrb[28].mxu0  ;;  %v804_v30 = vsel %vm740_vm9, %v699_v45, %v772_v48 }
 0x14e   :  { %v594_v61 = vadd.f32 %v593_v50, %v2076_v56  ;;  %v595_v1 = vpop.f32.mrb[29].mxu0  ;;  %v805_v2 = vsel %vm741_vm10, %v701_v14, %v773_v27 }
 0x14f   :  { %v596_v3 = vadd.f32 %v595_v1, %v2081_v58  ;;  %v597_v34 = vpop.f32.mrb[30].mxu0  ;;  %v806_v7 = vsel %vm742_vm11, %v703_v49, %v774_v52  ;;  %v823_v33 = vpack.c.bf16 %v805_v2, %v803_v62 }
 0x150   :  { %v707_v37 = vadd.f32 %v2145_v60, %v594_v61  ;;  %v598_v10 = vadd.f32 %v597_v34, %v2076_v56  ;;  %v599_v55 = vpop.f32.mrb[31].mxu0  ;;  %v824_v13 = vpack.c.bf16 %v806_v7, %v804_v30 }
 0x151   :  { %v709_v15 = vadd.f32 %v2149_v63, %v596_v3  ;;  %v600_v36 = vadd.f32 %v599_v55, %v2081_v58 }
 0x152   :  { %v775_v16 = vmul.f32 0.2, %v707_v37  ;;  %v711_v17 = vadd.f32 %v2152_v6, %v598_v10  ;;  %1123 = vmatprep.mubr.bf16.mxu1 %v824_v13  ;;  %vm743_vm12 = vcmp.gt.f32.partialorder %v707_v37, 0.0  ;;  %v2184_v6 = vld [vmem:[%s2242_s5] sm:$0x3] }
 0x153   :  { %v776_v57 = vmul.f32 0.2, %v709_v15  ;;  %v713_v18 = vadd.f32 %v2155_v54, %v600_v36  ;;  %1124 = vmatmul.mubr.bf16.gmra.mrb[56].mxu1 %v823_v33  ;;  %vm744_vm13 = vcmp.gt.f32.partialorder %v709_v15, 0.0  ;;  %v1259_v54 = vrot.slane %v2184_v6, %v2069_v53 }
 0x154   :  { %vm745_vm14 = vcmp.gt.f32.partialorder %v711_v17, 0.0  ;;  %v777_v60 = vmul.f32 0.2, %v711_v17  ;;  %v807_v19 = vsel %vm743_vm12, %v707_v37, %v775_v16 }
 0x155   :  { %vm746_vm15 = vcmp.gt.f32.partialorder %v713_v18, 0.0  ;;  %v778_v56 = vmul.f32 0.2, %v713_v18  ;;  %v808_v20 = vsel %vm744_vm13, %v709_v15, %v776_v57  ;;  %1326 = vmatprep.mubr.f32.mxu0 %v1259_v54 }
 0x156   :  { %v809_v39 = vsel %vm745_vm14, %v711_v17, %v777_v60 }
 0x157   :  { %v810_v63 = vsel %vm746_vm15, %v713_v18, %v778_v56  ;;  %v825_v21 = vpack.c.bf16 %v809_v39, %v807_v19 }
 0x158   :  { %v826_v58 = vpack.c.bf16 %v810_v63, %v808_v20 }
 0x15a   :  { %1133 = vmatprep.mubr.bf16.mxu1 %v826_v58 }
 0x15b   :  { %1134 = vmatmul.mubr.bf16.gmra.mrb[60].mxu1 %v825_v21 }
 0x1f6   :  { %v1065_v26 = vpop.f32.mrb[32].mxu1 }
 0x1f7   :  { %v1066_v28 = vadd.f32 %v1065_v26, %v2195_v24  ;;  %v1067_v29 = vpop.f32.mrb[33].mxu1 }
 0x1f8   :  { %v1068_v0 = vadd.f32 %v1067_v29, %v2198_v25  ;;  %v1069_v31 = vpop.f32.mrb[34].mxu1 }
 0x1f9   :  { %v1176_v32 = vmul.f32 0.2, %v1066_v28  ;;  %v1070_v5 = vadd.f32 %v1069_v31, %v2195_v24  ;;  %v1071_v4 = vpop.f32.mrb[35].mxu1  ;;  %vm1144_vm0 = vcmp.gt.f32.partialorder %v1066_v28, 0.0 }
 0x1fa   :  { %v1177_v35 = vmul.f32 0.2, %v1068_v0  ;;  %v1072_v8 = vadd.f32 %v1071_v4, %v2198_v25  ;;  %vm1145_vm1 = vcmp.gt.f32.partialorder %v1068_v0, 0.0 }
 0x1fb   :  { %vm1146_vm2 = vcmp.gt.f32.partialorder %v1070_v5, 0.0  ;;  %v1178_v38 = vmul.f32 0.2, %v1070_v5  ;;  %v1208_v9 = vsel %vm1144_vm0, %v1066_v28, %v1176_v32 }
 0x1fc   :  { %vm1147_vm3 = vcmp.gt.f32.partialorder %v1072_v8, 0.0  ;;  %v1179_v53 = vmul.f32 0.2, %v1072_v8  ;;  %v1209_v12 = vsel %vm1145_vm1, %v1068_v0, %v1177_v35 }
 0x1fd   :  { %v1210_v40 = vsel %vm1146_vm2, %v1070_v5, %v1178_v38 }
 0x1fe   :  { %v1450_v41 = vpack.c.bf16 %v1210_v40, %v1208_v9  ;;  %v1075_v42 = vpop.f32.mrb[36].mxu1  ;;  %v1211_v11 = vsel %vm1147_vm3, %v1072_v8, %v1179_v53 }
 0x1ff   :  { %v1076_v43 = vadd.f32 %v1075_v42, %v2195_v24  ;;  %v1077_v44 = vpop.f32.mrb[37].mxu1  ;;  %v1448_v45 = vpack.c.bf16 %v1211_v11, %v1209_v12 }
 0x200   :  { %v1078_v46 = vadd.f32 %v1077_v44, %v2198_v25  ;;  %v1079_v47 = vpop.f32.mrb[38].mxu1 }
 0x201   :  { %v1180_v14 = vmul.f32 0.2, %v1076_v43  ;;  %v1080_v48 = vadd.f32 %v1079_v47, %v2195_v24  ;;  %v1081_v49 = vpop.f32.mrb[39].mxu1  ;;  %1449 = vmatprep.subr.bf16.mxu0 %v1448_v45  ;;  %vm1148_vm4 = vcmp.gt.f32.partialorder %v1076_v43, 0.0 }
 0x202   :  { %v1181_v27 = vmul.f32 0.2, %v1078_v46  ;;  %v1082_v52 = vadd.f32 %v1081_v49, %v2198_v25  ;;  %1451 = vmatpush1.bf16.xpose.msra.mxu0 %v1450_v41  ;;  %vm1149_vm5 = vcmp.gt.f32.partialorder %v1078_v46, 0.0 }
 0x203   :  { %vm1150_vm6 = vcmp.gt.f32.partialorder %v1080_v48, 0.0  ;;  %v1182_v50 = vmul.f32 0.2, %v1080_v48  ;;  %v1212_v1 = vsel %vm1148_vm4, %v1076_v43, %v1180_v14 }
 0x204   :  { %vm1151_vm7 = vcmp.gt.f32.partialorder %v1082_v52, 0.0  ;;  %v1183_v61 = vmul.f32 0.2, %v1082_v52  ;;  %v1213_v34 = vsel %vm1149_vm5, %v1078_v46, %v1181_v27 }
 0x205   :  { %v1214_v62 = vsel %vm1150_vm6, %v1080_v48, %v1182_v50 }
 0x206   :  { %v1454_v2 = vpack.c.bf16 %v1214_v62, %v1212_v1  ;;  %v1085_v3 = vpop.f32.mrb[40].mxu1  ;;  %v1215_v30 = vsel %vm1151_vm7, %v1082_v52, %v1183_v61 }
 0x207   :  { %v1086_v7 = vadd.f32 %v1085_v3, %v2195_v24  ;;  %v1087_v33 = vpop.f32.mrb[41].mxu1  ;;  %v1452_v37 = vpack.c.bf16 %v1215_v30, %v1213_v34 }
 0x208   :  { %v1088_v10 = vadd.f32 %v1087_v33, %v2198_v25  ;;  %v1089_v55 = vpop.f32.mrb[42].mxu1 }
 0x209   :  { %v1184_v13 = vmul.f32 0.2, %v1086_v7  ;;  %v1090_v15 = vadd.f32 %v1089_v55, %v2195_v24  ;;  %v1091_v36 = vpop.f32.mrb[43].mxu1  ;;  %1453 = vmatprep.subr.bf16.mxu0 %v1452_v37  ;;  %vm1152_vm8 = vcmp.gt.f32.partialorder %v1086_v7, 0.0 }
 0x20a   :  { %v1185_v16 = vmul.f32 0.2, %v1088_v10  ;;  %v1092_v17 = vadd.f32 %v1091_v36, %v2198_v25  ;;  %1455 = vmatpush1.bf16.xpose.msra.mxu0 %v1454_v2  ;;  %vm1153_vm9 = vcmp.gt.f32.partialorder %v1088_v10, 0.0 }
 0x20b   :  { %vm1154_vm10 = vcmp.gt.f32.partialorder %v1090_v15, 0.0  ;;  %v1186_v57 = vmul.f32 0.2, %v1090_v15  ;;  %v1216_v60 = vsel %vm1152_vm8, %v1086_v7, %v1184_v13 }
 0x20c   :  { %vm1155_vm11 = vcmp.gt.f32.partialorder %v1092_v17, 0.0  ;;  %v1187_v18 = vmul.f32 0.2, %v1092_v17  ;;  %v1217_v20 = vsel %vm1153_vm9, %v1088_v10, %v1185_v16 }
 0x20d   :  { %v1218_v56 = vsel %vm1154_vm10, %v1090_v15, %v1186_v57 }
 0x20e   :  { %v1458_v19 = vpack.c.bf16 %v1218_v56, %v1216_v60  ;;  %v1095_v39 = vpop.f32.mrb[44].mxu1  ;;  %v1219_v63 = vsel %vm1155_vm11, %v1092_v17, %v1187_v18 }
 0x20f   :  { %v1096_v21 = vadd.f32 %v1095_v39, %v2195_v24  ;;  %v1097_v58 = vpop.f32.mrb[45].mxu1  ;;  %v1456_v54 = vpack.c.bf16 %v1219_v63, %v1217_v20 }
 0x210   :  { %v1098_v22 = vadd.f32 %v1097_v58, %v2198_v25  ;;  %v1099_v59 = vpop.f32.mrb[46].mxu1 }
 0x211   :  { %v1188_v23 = vmul.f32 0.2, %v1096_v21  ;;  %v1100_v26 = vadd.f32 %v1099_v59, %v2195_v24  ;;  %v1101_v28 = vpop.f32.mrb[47].mxu1  ;;  %1457 = vmatprep.subr.bf16.mxu0 %v1456_v54  ;;  %vm1156_vm12 = vcmp.gt.f32.partialorder %v1096_v21, 0.0 }
 0x212   :  { %v1189_v29 = vmul.f32 0.2, %v1098_v22  ;;  %v1102_v0 = vadd.f32 %v1101_v28, %v2198_v25  ;;  %1459 = vmatpush1.bf16.xpose.msra.mxu0 %v1458_v19  ;;  %vm1157_vm13 = vcmp.gt.f32.partialorder %v1098_v22, 0.0 }
 0x213   :  { %vm1158_vm14 = vcmp.gt.f32.partialorder %v1100_v26, 0.0  ;;  %v1190_v31 = vmul.f32 0.2, %v1100_v26  ;;  %v1220_v5 = vsel %vm1156_vm12, %v1096_v21, %v1188_v23 }
 0x214   :  { %vm1159_vm15 = vcmp.gt.f32.partialorder %v1102_v0, 0.0  ;;  %v1191_v32 = vmul.f32 0.2, %v1102_v0  ;;  %v1221_v38 = vsel %vm1157_vm13, %v1098_v22, %v1189_v29 }
 0x215   :  { %v1222_v4 = vsel %vm1158_vm14, %v1100_v26, %v1190_v31 }
 0x216   :  { %v1462_v35 = vpack.c.bf16 %v1222_v4, %v1220_v5  ;;  %v1105_v8 = vpop.f32.mrb[48].mxu1  ;;  %v1223_v53 = vsel %vm1159_vm15, %v1102_v0, %v1191_v32 }
 0x217   :  { %v1106_v9 = vadd.f32 %v1105_v8, %v2195_v24  ;;  %v1107_v40 = vpop.f32.mrb[49].mxu1  ;;  %v1460_v41 = vpack.c.bf16 %v1223_v53, %v1221_v38 }
 0x218   :  { %v1108_v42 = vadd.f32 %v1107_v40, %v2198_v25  ;;  %v1109_v12 = vpop.f32.mrb[50].mxu1 }
 0x219   :  { %v1192_v11 = vmul.f32 0.2, %v1106_v9  ;;  %v1110_v43 = vadd.f32 %v1109_v12, %v2195_v24  ;;  %v1111_v44 = vpop.f32.mrb[51].mxu1  ;;  %1461 = vmatprep.subr.bf16.mxu0 %v1460_v41  ;;  %vm1160_vm0 = vcmp.gt.f32.partialorder %v1106_v9, 0.0 }
 0x21a   :  { %v1193_v45 = vmul.f32 0.2, %v1108_v42  ;;  %v1112_v46 = vadd.f32 %v1111_v44, %v2198_v25  ;;  %1463 = vmatpush1.bf16.xpose.msra.mxu0 %v1462_v35  ;;  %vm1161_vm1 = vcmp.gt.f32.partialorder %v1108_v42, 0.0 }
 0x21b   :  { %vm1162_vm2 = vcmp.gt.f32.partialorder %v1110_v43, 0.0  ;;  %v1194_v47 = vmul.f32 0.2, %v1110_v43  ;;  %v1224_v48 = vsel %vm1160_vm0, %v1106_v9, %v1192_v11 }
 0x21c   :  { %vm1163_vm3 = vcmp.gt.f32.partialorder %v1112_v46, 0.0  ;;  %v1195_v14 = vmul.f32 0.2, %v1112_v46  ;;  %v1225_v50 = vsel %vm1161_vm1, %v1108_v42, %v1193_v45 }
 0x21d   :  { %v1226_v49 = vsel %vm1162_vm2, %v1110_v43, %v1194_v47 }
 0x21e   :  { %v1466_v27 = vpack.c.bf16 %v1226_v49, %v1224_v48  ;;  %v1115_v52 = vpop.f32.mrb[52].mxu1  ;;  %v1227_v61 = vsel %vm1163_vm3, %v1112_v46, %v1195_v14  ;;  %v1245_v48 = vpop.permute.xlu0 %1244 }
 0x21f   :  { %v1116_v1 = vadd.f32 %v1115_v52, %v2195_v24  ;;  %v1117_v62 = vpop.f32.mrb[53].mxu1  ;;  %v1464_v2 = vpack.c.bf16 %v1227_v61, %v1225_v50 }
 0x220   :  { %v1118_v3 = vadd.f32 %v1117_v62, %v2198_v25  ;;  %v1119_v34 = vpop.f32.mrb[54].mxu1 }
 0x221   :  { %v1196_v30 = vmul.f32 0.2, %v1116_v1  ;;  %v1120_v7 = vadd.f32 %v1119_v34, %v2195_v24  ;;  %v1121_v33 = vpop.f32.mrb[55].mxu1  ;;  %1465 = vmatprep.subr.bf16.mxu0 %v1464_v2  ;;  %vm1164_vm4 = vcmp.gt.f32.partialorder %v1116_v1, 0.0 }
 0x222   :  { %v1197_v37 = vmul.f32 0.2, %v1118_v3  ;;  %v1122_v10 = vadd.f32 %v1121_v33, %v2198_v25  ;;  %1467 = vmatpush1.bf16.xpose.msra.mxu0 %v1466_v27  ;;  %vm1165_vm5 = vcmp.gt.f32.partialorder %v1118_v3, 0.0 }
 0x223   :  { %vm1166_vm6 = vcmp.gt.f32.partialorder %v1120_v7, 0.0  ;;  %v1198_v55 = vmul.f32 0.2, %v1120_v7  ;;  %v1228_v15 = vsel %vm1164_vm4, %v1116_v1, %v1196_v30 }
 0x224   :  { %vm1167_vm7 = vcmp.gt.f32.partialorder %v1122_v10, 0.0  ;;  %v1199_v13 = vmul.f32 0.2, %v1122_v10  ;;  %v1229_v57 = vsel %vm1165_vm5, %v1118_v3, %v1197_v37 }
 0x225   :  { %v1230_v36 = vsel %vm1166_vm6, %v1120_v7, %v1198_v55 }
 0x226   :  { %v1470_v16 = vpack.c.bf16 %v1230_v36, %v1228_v15  ;;  %v1125_v17 = vpop.f32.mrb[56].mxu1  ;;  %v1231_v18 = vsel %vm1167_vm7, %v1122_v10, %v1199_v13 }
 0x227   :  { %v1126_v60 = vadd.f32 %v1125_v17, %v2195_v24  ;;  %v1127_v56 = vpop.f32.mrb[57].mxu1  ;;  %v1468_v19 = vpack.c.bf16 %v1231_v18, %v1229_v57 }
 0x228   :  { %v1128_v39 = vadd.f32 %v1127_v56, %v2198_v25  ;;  %v1129_v20 = vpop.f32.mrb[58].mxu1 }
 0x229   :  { %v1200_v63 = vmul.f32 0.2, %v1126_v60  ;;  %v1130_v21 = vadd.f32 %v1129_v20, %v2195_v24  ;;  %v1131_v58 = vpop.f32.mrb[59].mxu1  ;;  %1469 = vmatprep.subr.bf16.mxu0 %v1468_v19  ;;  %vm1168_vm8 = vcmp.gt.f32.partialorder %v1126_v60, 0.0 }
 0x22a   :  { %v1201_v54 = vmul.f32 0.2, %v1128_v39  ;;  %v1132_v22 = vadd.f32 %v1131_v58, %v2198_v25  ;;  %1471 = vmatpush1.bf16.xpose.msra.mxu0 %v1470_v16  ;;  %vm1169_vm9 = vcmp.gt.f32.partialorder %v1128_v39, 0.0 }
 0x22b   :  { %vm1170_vm10 = vcmp.gt.f32.partialorder %v1130_v21, 0.0  ;;  %v1202_v59 = vmul.f32 0.2, %v1130_v21  ;;  %v1232_v26 = vsel %vm1168_vm8, %v1126_v60, %v1200_v63 }
 0x22c   :  { %vm1171_vm11 = vcmp.gt.f32.partialorder %v1132_v22, 0.0  ;;  %v1203_v23 = vmul.f32 0.2, %v1132_v22  ;;  %v1233_v31 = vsel %vm1169_vm9, %v1128_v39, %v1201_v54 }
 0x22d   :  { %v1234_v28 = vsel %vm1170_vm10, %v1130_v21, %v1202_v59 }
 0x22e   :  { %v1474_v29 = vpack.c.bf16 %v1234_v28, %v1232_v26  ;;  %v1135_v0 = vpop.f32.mrb[60].mxu1  ;;  %v1235_v32 = vsel %vm1171_vm11, %v1132_v22, %v1203_v23 }
 0x22f   :  { %v1136_v5 = vadd.f32 %v1135_v0, %v2195_v24  ;;  %v1137_v4 = vpop.f32.mrb[61].mxu1  ;;  %v1472_v35 = vpack.c.bf16 %v1235_v32, %v1233_v31 }
 0x230   :  { %v1138_v8 = vadd.f32 %v1137_v4, %v2198_v25  ;;  %v1139_v38 = vpop.f32.mrb[62].mxu1 }
 0x231   :  { %v1204_v53 = vmul.f32 0.2, %v1136_v5  ;;  %v1140_v9 = vadd.f32 %v1139_v38, %v2195_v24  ;;  %v1141_v40 = vpop.f32.mrb[63].mxu1  ;;  %1473 = vmatprep.subr.bf16.mxu0 %v1472_v35  ;;  %vm1172_vm12 = vcmp.gt.f32.partialorder %v1136_v5, 0.0  ;;  %v1255_v24 = vrot.slane %v2184_v6, %v2064_v51 }
 0x232   :  { %v1205_v41 = vmul.f32 0.2, %v1138_v8  ;;  %v1142_v42 = vadd.f32 %v1141_v40, %v2198_v25  ;;  %1475 = vmatpush1.bf16.xpose.msra.mxu0 %v1474_v29  ;;  %vm1173_vm13 = vcmp.gt.f32.partialorder %v1138_v8, 0.0  ;;  %v1250_v25 = vrot.slane %v1245_v48, %v2064_v51 }
 0x233   :  { %vm1174_vm14 = vcmp.gt.f32.partialorder %v1140_v9, 0.0  ;;  %v1206_v12 = vmul.f32 0.2, %v1140_v9  ;;  %v1236_v43 = vsel %vm1172_vm12, %v1136_v5, %v1204_v53 }
 0x234   :  { %vm1175_vm15 = vcmp.gt.f32.partialorder %v1142_v42, 0.0  ;;  %v1207_v11 = vmul.f32 0.2, %v1142_v42  ;;  %v1237_v46 = vsel %vm1173_vm13, %v1138_v8, %v1205_v41 }
 0x235   :  { %v1238_v44 = vsel %vm1174_vm14, %v1140_v9, %v1206_v12 }
 0x236   :  { %v1478_v45 = vpack.c.bf16 %v1238_v44, %v1236_v43  ;;  %v1239_v47 = vsel %vm1175_vm15, %v1142_v42, %v1207_v11 }
 0x237   :  { %v1476_v14 = vpack.c.bf16 %v1239_v47, %v1237_v46 }
 0x239   :  { %1477 = vmatprep.subr.bf16.mxu0 %v1476_v14 }
 0x23a   :  { %1479 = vmatpush1.bf16.xpose.msra.mxu0 %v1478_v45 }
 0x241   :  { %1327 = vmatmul.mubr.f32.vlgmr.msra.gmra.mrb[32].mxu0 %v1255_v24 }
 0x314   :  { %v1328_v49 = vpop.f32.mrb[32].mxu0 }
 0x315   :  { %v1329_v27 = vadd.f32 %v1328_v49, %v1250_v25  ;;  %v1330_v52 = vpop.f32.mrb[33].mxu0 }
 0x317   :  { %v1447_v50 = vmul.f32 -1.442695, %v1329_v27 }
 0x319   :  { %1698 = vpow2.f32 %v1447_v50 }
 0x323   :  { %v1699_v61 = vpop.eup %1698 }
 0x324   :  { %v1335_v1 = vadd.f32 1.0, %v1699_v61 }
 0x326   :  { %1700 = vrcp.f32 %v1335_v1 }
 0x330   :  { %v1701_v62 = vpop.eup %1700 }
 0x331   :  { %1338 = vst [vmem:[%s2245_s7] sm:$0x1] %v1701_v62 }

</bundles_post_ra>
